<compile_context>
chip_gen: v7x
topology: tpu7x:2x2x1
jax: 0.10.0
libtpu: 0.0.40
codegen_flags: <defaults>
</compile_context>

<pallas_src>
import math

import jax
import jax.numpy as jnp
import numpy as np
from jax.experimental import pallas as pl
from jax.experimental.pallas import tpu as pltpu


def _round_up(x: int, m: int) -> int:
    return ((x + m - 1) // m) * m


# ----------------------------------------------------------------------------
# Seasonality basis (identical to SeasonalityGenerator.__init__)
# ----------------------------------------------------------------------------
def make_seasonality_basis(target_length: int) -> np.ndarray:
    assert target_length % 2 == 0, "SeasonalityGenerator assumes even target_length"
    half_minus_one = int(target_length / 2 - 1)
    t = np.arange(target_length, dtype=np.float32) / target_length
    cols = [np.ones(target_length, dtype=np.float32)]
    cols += [np.cos(t * 2.0 * np.pi * i).astype(np.float32)
             for i in range(1, half_minus_one + 1)]
    cols += [np.sin(t * 2.0 * np.pi * i).astype(np.float32)
             for i in range(1, half_minus_one + 1)]
    basis = np.stack(cols, axis=1).T  # (1 + 2*half_minus_one, target_length)
    return basis


# ----------------------------------------------------------------------------
# Pallas kernel: fused MLP stack + (basis-folded) output projection
# ----------------------------------------------------------------------------
def make_seasonality_block_kernel(n_mlp_layers: int):
    def kernel(*refs):
        # refs layout:
        #   x_tile, (W_i, b_i) * n_mlp_layers, W_out_fused, out_tile
        idx = 0
        h = refs[idx][...]
        idx += 1
        for _ in range(n_mlp_layers):
            w_ref = refs[idx]
            b_ref = refs[idx + 1]
            idx += 2
            h = jnp.dot(h.astype(w_ref.dtype), w_ref[...],
                        preferred_element_type=jnp.float32) + b_ref[...]
            h = jnp.maximum(h, 0.0)  # nn.ReLU()
        w_out_ref = refs[idx]
        out_ref = refs[idx + 1]
        out_ref[...] = jnp.dot(h.astype(w_out_ref.dtype), w_out_ref[...],
                               preferred_element_type=jnp.float32
                               ).astype(out_ref.dtype)

    return kernel


# ----------------------------------------------------------------------------
# Wrapper: tiling over nodes, basis folding, lane-dense output slab
# ----------------------------------------------------------------------------
def seasonality_block_forward(x, params, basis_b, basis_f,
                              backcast_length, forecast_length,
                              *, tile_n=512, compute_dtype=jnp.float32):
    """x: (N, backcast_length) or (N, backcast_length, 1) float32."""
    # squeeze_dim(x): drop trailing singleton dim if present (glue).
    if x.ndim == 3 and x.shape[-1] == 1:
        x = x[..., 0]
    n_nodes, in_len = x.shape
    assert in_len == backcast_length

    mlp_ws, mlp_bs, wb, wf = params
    n_mlp_layers = len(mlp_ws)
    assert wb.shape[1] == basis_b.shape[0]
    assert wf.shape[1] == basis_f.shape[0]

    # Fold the fixed Fourier bases into the theta projections offline, and
    # concatenate into one lane-dense output weight (padded to 128 lanes).
    wb_fused = (wb @ basis_b).astype(jnp.float32)   # (hidden_last, backcast_length)
    wf_fused = (wf @ basis_f).astype(jnp.float32)   # (hidden_last, forecast_length)
    out_width = backcast_length + forecast_length
    out_pad = _round_up(out_width, 128)
    w_out = jnp.zeros((wb.shape[0], out_pad), jnp.float32)
    w_out = w_out.at[:, :backcast_length].set(wb_fused)
    w_out = w_out.at[:, backcast_length:out_width].set(wf_fused)

    # Row tiling over graph nodes (independent rows). Tile is a multiple of 8
    # (f32 sublane); pad N so the grid divides evenly.
    tile_n = _round_up(min(tile_n, max(8, _round_up(n_nodes, 8))), 8)
    n_pad = _round_up(max(n_nodes, tile_n), tile_n)
    x_p = x.astype(compute_dtype)
    if n_pad != n_nodes:
        x_p = jnp.pad(x_p, ((0, n_pad - n_nodes), (0, 0)))
    grid = (n_pad // tile_n,)

    inputs = [x_p]
    in_specs = [pl.BlockSpec((tile_n, in_len), lambda i: (i, 0))]
    for w, b in zip(mlp_ws, mlp_bs):
        wc = w.astype(compute_dtype)
        bc = b.astype(jnp.float32)
        inputs += [wc, bc]
        # Weights/biases: same block every grid step -> stay VMEM-resident.
        in_specs += [pl.BlockSpec(wc.shape, lambda i: (0, 0)),
                     pl.BlockSpec(bc.shape, lambda i: (0, 0))]
    w_out_c = w_out.astype(compute_dtype)
    inputs.append(w_out_c)
    in_specs.append(pl.BlockSpec(w_out_c.shape, lambda i: (0, 0)))

    out_spec = pl.BlockSpec((tile_n, out_pad), lambda i: (i, 0))
    out_shape = jax.ShapeDtypeStruct((n_pad, out_pad), jnp.float32)

    # Advisory cost estimate for XLA's scheduler.
    dims = [in_len] + [int(w.shape[1]) for w in mlp_ws]
    flops = 0
    for kdim, mdim in zip(dims[:-1], dims[1:]):
        flops += 2 * n_pad * kdim * mdim
    flops += 2 * n_pad * dims[-1] * out_pad
    bytes_accessed = int(
        x_p.size * x_p.dtype.itemsize
        + sum(int(a.size) * a.dtype.itemsize for a in inputs[1:])
        + n_pad * out_pad * 4)

    # VMEM budget: double-buffered x tile + double-buffered output tile +
    # resident weights/biases; 2x headroom, capped well under v7x's 64 MiB.
    itemsize = jnp.dtype(compute_dtype).itemsize
    vmem_est = (2 * tile_n * in_len * itemsize
                + 2 * tile_n * out_pad * 4
                + sum(int(a.size) * a.dtype.itemsize for a in inputs[1:]))
    vmem_limit = int(min(max(2 * vmem_est, 8 << 20), 48 << 20))

    out = pl.pallas_call(
        make_seasonality_block_kernel(n_mlp_layers),
        out_shape=out_shape,
        grid=grid,
        in_specs=in_specs,
        out_specs=out_spec,
        compiler_params=pltpu.CompilerParams(
            dimension_semantics=("parallel",),   # shard row tiles across TCs
            vmem_limit_bytes=vmem_limit),
        cost_estimate=pl.CostEstimate(flops=flops, transcendentals=0,
                                      bytes_accessed=bytes_accessed),
    )(*inputs)

    backcast = out[:n_nodes, :backcast_length]
    forecast = out[:n_nodes, backcast_length:out_width]
    return backcast, forecast


# ----------------------------------------------------------------------------
# Deterministic parameter initialization (same shapes as the module __init__)
# ----------------------------------------------------------------------------
def init_params(key, backcast_length, n_theta_hidden, thetas_dim):
    mlp_ws, mlp_bs = [], []
    in_dim = backcast_length
    for h in n_theta_hidden:
        key, k1, k2 = jax.random.split(key, 3)
        bound = 1.0 / math.sqrt(in_dim)
        # stored as (in, out) == transpose of torch's (out, in)
        w = jax.random.uniform(k1, (in_dim, h), jnp.float32, -bound, bound)
        b = jax.random.uniform(k2, (1, h), jnp.float32, -bound, bound)
        mlp_ws.append(w)
        mlp_bs.append(b)
        in_dim = h
    key, k1, k2 = jax.random.split(key, 3)
    bound = 1.0 / math.sqrt(in_dim)
    wb = jax.random.uniform(k1, (in_dim, thetas_dim[0]), jnp.float32, -bound, bound)
    wf = jax.random.uniform(k2, (in_dim, thetas_dim[1]), jnp.float32, -bound, bound)
    return mlp_ws, mlp_bs, wb, wf


# ----------------------------------------------------------------------------
# Pure-JAX reference (unfused math, for correctness check)
# ----------------------------------------------------------------------------
def reference_forward(x, params, basis_b, basis_f):
    if x.ndim == 3 and x.shape[-1] == 1:
        x = x[..., 0]
    mlp_ws, mlp_bs, wb, wf = params
    h = x
    for w, b in zip(mlp_ws, mlp_bs):
        h = jnp.maximum(h @ w + b, 0.0)
    theta_b = h @ wb
    theta_f = h @ wf
    return theta_b @ basis_b, theta_f @ basis_f


if __name__ == "__main__":
    # Small, module-consistent config.
    backcast_length = 16
    forecast_length = 8
    n_theta_hidden = [32, 32]
    # thetas_dim must match the seasonality basis rows: 1 + 2*(L/2 - 1)
    thetas_dim = (
        1 + 2 * int(backcast_length / 2 - 1),   # 15
        1 + 2 * int(forecast_length / 2 - 1),   # 7
    )
    n_nodes = 8  # graph nodes

    key = jax.random.PRNGKey(0)
    key, kx = jax.random.split(key)
    # x as produced upstream: (N, backcast_length, 1) -> squeeze_dim -> (N, L)
    x = jax.random.normal(kx, (n_nodes, backcast_length, 1), jnp.float32)

    params = init_params(key, backcast_length, n_theta_hidden, thetas_dim)
    basis_b = jnp.asarray(make_seasonality_basis(backcast_length))  # (15, 16)
    basis_f = jnp.asarray(make_seasonality_basis(forecast_length))  # (7, 8)

    # edge_index / edge_weight accepted by the module signature but unused here
    # (inter_correlation_stack_length = 0; see TODO(synk) above).
    edge_index = jnp.stack(
        [jnp.arange(n_nodes), (jnp.arange(n_nodes) + 1) % n_nodes], axis=0
    )
    edge_weight = jnp.ones((n_nodes,), jnp.float32)

    backcast, forecast = seasonality_block_forward(
        x, params, basis_b, basis_f, backcast_length, forecast_length
    )
    jax.block_until_ready((backcast, forecast))

    ref_b, ref_f = reference_forward(x, params, basis_b, basis_f)
    np.testing.assert_allclose(np.asarray(backcast), np.asarray(ref_b),
                               rtol=1e-5, atol=1e-5)
    np.testing.assert_allclose(np.asarray(forecast), np.asarray(ref_f),
                               rtol=1e-5, atol=1e-5)

    assert backcast.shape == (n_nodes, backcast_length)
    assert forecast.shape == (n_nodes, forecast_length)
    print("KERNEL_OK")
</pallas_src>

<mosaic_0001>
module attributes {stable_mosaic.version = 11 : i64} {
  func.func @kernel(%arg0: i32, %arg1: memref<8x16xf32, #tpu.memory_space<vmem>>, %arg2: memref<16x32xf32, #tpu.memory_space<vmem>>, %arg3: memref<1x32xf32, #tpu.memory_space<vmem>>, %arg4: memref<32x32xf32, #tpu.memory_space<vmem>>, %arg5: memref<1x32xf32, #tpu.memory_space<vmem>>, %arg6: memref<32x128xf32, #tpu.memory_space<vmem>>, %arg7: memref<8x128xf32, #tpu.memory_space<vmem>>) attributes {dimension_semantics = [#tpu.dimension_semantics<parallel>], iteration_bounds = array<i64: 1>, scalar_prefetch = 0 : i64, scratch_operands = 0 : i64, tpu.core_type = #tpu.core_type<tc>, window_params = [{transform_indices = @transform_0, window_bounds = array<i64: 8, 16>}, {pipeline_mode = #tpu.pipeline_mode<synchronous>, transform_indices = @transform_1, window_bounds = array<i64: 16, 32>}, {pipeline_mode = #tpu.pipeline_mode<synchronous>, transform_indices = @transform_2, window_bounds = array<i64: 1, 32>}, {pipeline_mode = #tpu.pipeline_mode<synchronous>, transform_indices = @transform_3, window_bounds = array<i64: 32, 32>}, {pipeline_mode = #tpu.pipeline_mode<synchronous>, transform_indices = @transform_4, window_bounds = array<i64: 1, 32>}, {pipeline_mode = #tpu.pipeline_mode<synchronous>, transform_indices = @transform_5, window_bounds = array<i64: 32, 128>}, {transform_indices = @transform_6, window_bounds = array<i64: 8, 128>}]} {
    %c0 = arith.constant 0 : index
    %c0_0 = arith.constant 0 : index
    %0 = vector.load %arg1[%c0, %c0_0] : memref<8x16xf32, #tpu.memory_space<vmem>>, vector<8x16xf32>
    %c0_1 = arith.constant 0 : index
    %c0_2 = arith.constant 0 : index
    %1 = vector.load %arg2[%c0_1, %c0_2] : memref<16x32xf32, #tpu.memory_space<vmem>>, vector<16x32xf32>
    %cst = arith.constant dense<0.000000e+00> : vector<8x32xf32>
    %2 = tpu.matmul %0, %1, %cst {dimension_numbers = #tpu.dot_dimension_numbers<[1], [0], [0], [1], [0, 0, 1, 1], [], []>} : vector<8x16xf32>, vector<16x32xf32>, vector<8x32xf32> -> vector<8x32xf32>
    %c0_3 = arith.constant 0 : index
    %c0_4 = arith.constant 0 : index
    %3 = vector.load %arg3[%c0_3, %c0_4] : memref<1x32xf32, #tpu.memory_space<vmem>>, vector<1x32xf32>
    %4 = vector.broadcast %3 : vector<1x32xf32> to vector<8x32xf32>
    %5 = arith.addf %2, %4 : vector<8x32xf32>
    %cst_5 = arith.constant 0.000000e+00 : f32
    %6 = vector.broadcast %cst_5 : f32 to vector<8x32xf32>
    %7 = arith.maximumf %5, %6 : vector<8x32xf32>
    %c0_6 = arith.constant 0 : index
    %c0_7 = arith.constant 0 : index
    %8 = vector.load %arg4[%c0_6, %c0_7] : memref<32x32xf32, #tpu.memory_space<vmem>>, vector<32x32xf32>
    %cst_8 = arith.constant dense<0.000000e+00> : vector<8x32xf32>
    %9 = tpu.matmul %7, %8, %cst_8 {dimension_numbers = #tpu.dot_dimension_numbers<[1], [0], [0], [1], [0, 0, 1, 1], [], []>} : vector<8x32xf32>, vector<32x32xf32>, vector<8x32xf32> -> vector<8x32xf32>
    %c0_9 = arith.constant 0 : index
    %c0_10 = arith.constant 0 : index
    %10 = vector.load %arg5[%c0_9, %c0_10] : memref<1x32xf32, #tpu.memory_space<vmem>>, vector<1x32xf32>
    %11 = vector.broadcast %10 : vector<1x32xf32> to vector<8x32xf32>
    %12 = arith.addf %9, %11 : vector<8x32xf32>
    %cst_11 = arith.constant 0.000000e+00 : f32
    %13 = vector.broadcast %cst_11 : f32 to vector<8x32xf32>
    %14 = arith.maximumf %12, %13 : vector<8x32xf32>
    %c0_12 = arith.constant 0 : index
    %c0_13 = arith.constant 0 : index
    %15 = vector.load %arg6[%c0_12, %c0_13] : memref<32x128xf32, #tpu.memory_space<vmem>>, vector<32x128xf32>
    %cst_14 = arith.constant dense<0.000000e+00> : vector<8x128xf32>
    %16 = tpu.matmul %14, %15, %cst_14 {dimension_numbers = #tpu.dot_dimension_numbers<[1], [0], [0], [1], [0, 0, 1, 1], [], []>} : vector<8x32xf32>, vector<32x128xf32>, vector<8x128xf32> -> vector<8x128xf32>
    %c0_15 = arith.constant 0 : index
    %c0_16 = arith.constant 0 : index
    %17 = vector.load %arg7[%c0_15, %c0_16] : memref<8x128xf32, #tpu.memory_space<vmem>>, vector<8x128xf32>
    tpu.vector_store %arg7[%c0_15, %c0_16], %16 {strides = array<i32>} : memref<8x128xf32, #tpu.memory_space<vmem>>, vector<8x128xf32>,
    return
  }
  func.func @transform_0(%arg0: i32) -> (i32, i32) {
    %c0_i32 = arith.constant 0 : i32
    %c0_i32_0 = arith.constant 0 : i32
    return %arg0, %c0_i32 : i32, i32
  }
  func.func @transform_1(%arg0: i32) -> (i32, i32) {
    %c0_i32 = arith.constant 0 : i32
    %c0_i32_0 = arith.constant 0 : i32
    %c0_i32_1 = arith.constant 0 : i32
    return %c0_i32, %c0_i32_0 : i32, i32
  }
  func.func @transform_2(%arg0: i32) -> (i32, i32) {
    %c0_i32 = arith.constant 0 : i32
    %c0_i32_0 = arith.constant 0 : i32
    %c0_i32_1 = arith.constant 0 : i32
    return %c0_i32, %c0_i32_0 : i32, i32
  }
  func.func @transform_3(%arg0: i32) -> (i32, i32) {
    %c0_i32 = arith.constant 0 : i32
    %c0_i32_0 = arith.constant 0 : i32
    %c0_i32_1 = arith.constant 0 : i32
    return %c0_i32, %c0_i32_0 : i32, i32
  }
  func.func @transform_4(%arg0: i32) -> (i32, i32) {
    %c0_i32 = arith.constant 0 : i32
    %c0_i32_0 = arith.constant 0 : i32
    %c0_i32_1 = arith.constant 0 : i32
    return %c0_i32, %c0_i32_0 : i32, i32
  }
  func.func @transform_5(%arg0: i32) -> (i32, i32) {
    %c0_i32 = arith.constant 0 : i32
    %c0_i32_0 = arith.constant 0 : i32
    %c0_i32_1 = arith.constant 0 : i32
    return %c0_i32, %c0_i32_0 : i32, i32
  }
  func.func @transform_6(%arg0: i32) -> (i32, i32) {
    %c0_i32 = arith.constant 0 : i32
    %c0_i32_0 = arith.constant 0 : i32
    return %arg0, %c0_i32 : i32, i32
  }
}

</mosaic_0001>

<bundles_post_ra>
// kernel: tpu_custom_call.1
= control target key start
LH: loop header
LB: loop body
LE: loop exit
PB: predicated region body
PF: predicated region fallthrough
CT: control target
= control target key end

     0   :  { %11 = vsyncpa [#allocation3], 0  ;;  %s656_s0 = inlined_call_operand.hbm [shape: f32[8,16], index: 0, kind: input, shape index: {}]   ;;  %s657_s1 = inlined_call_operand.hbm [shape: f32[16,32], index: 1, kind: input, shape index: {}]   ;;  %s658_s2 = inlined_call_operand.vmem [shape: f32[1,32], index: 2, kind: input, shape index: {}]   ;;  %s659_s3 = inlined_call_operand.hbm [shape: f32[32,32], index: 3, kind: input, shape index: {}]   ;;  %s660_s4 = inlined_call_operand.vmem [shape: f32[1,32], index: 4, kind: input, shape index: {}]   ;;  %s661_s5 = inlined_call_operand.hbm [shape: f32[32,128], index: 5, kind: input, shape index: {}]   ;;  %s662_s6 = inlined_call_operand.hbm [shape: f32[8,128], index: 6, kind: output, shape index: {}]  }
   0x1   :  { %12 = vsyncpa [#allocation6], 0 }
   0x2   :  { %13 = vsyncpa [#allocation9], 0 }
   0x3   :  { %14 = vsyncpa [#allocation4], 0  ;;  %s533_s21 = smov [#allocation5]   ;;  %s415_s25 = scalar_lea.hbm %s657_s1, 256 }
   0x4   :  { %s30_s22 = sshll.u32 %s533_s21, 4  ;;  %p416_p0 = scmp.ne.s32.totalorder %s657_s1, %s415_s25  ;;  %s31_s22 = int_to_ptr.vmem [resolvable:$true] %s30_s22 }
   0x5   :  { %p419_p1 = scmp.lt.u32.totalorder %s415_s25, %s657_s1 }
   0x7   :  { %p421_p2 = pnand %p419_p1, %p416_p0 }
   0x9   :  { %424 = shalt.err (!%p421_p2)
}
   0xa   :  { %s425_s30 = scalar_lea.vmem %s31_s22, 256  ;;  %p430_p4 = scmp.lt.s32.totalorder %s31_s22, %s31_s22 }
   0xb   :  { %p426_p3 = scmp.ne.s32.totalorder %s31_s22, %s425_s30  ;;  %p431_p5 = scmp.lt.s32.totalorder %s425_s30, %s425_s30 }
   0xd   :  { %p432_p6 = por %p431_p5, %p430_p4 }
   0xf   :  { %p433_p7 = pnand %p432_p6, %p426_p3 }
  0x11   :  { %436 = shalt.err (!%p433_p7)
}
  0x12   :  { %s534_s7 = smov 128   ;;  %s535_s8 = smov 8  }
  0x13   :  { %36 = dma.hbm_to_vmem [thread:$0]  %s657_s1, 256, %s31_s22, [#allocation6], %s534_s7, %s534_s7, %s535_s8  }
  0x14   :  { %s536_s11 = smov [#allocation2]   ;;  %s537_s13 = smov [#allocation7]  }
  0x15   :  { %s21_s12 = sshll.u32 %s536_s11, 4  ;;  %s44_s14 = sshll.u32 %s537_s13, 4  ;;  %s22_s12 = int_to_ptr.vmem [resolvable:$true] %s21_s12  ;;  %s45_s14 = int_to_ptr.vmem [resolvable:$true] %s44_s14 }
  0x16   :  { %s437_s17 = scalar_lea.hbm %s656_s0, 128 }
  0x17   :  { %p438_p8 = scmp.ne.s32.totalorder %s656_s0, %s437_s17  ;;  %p441_p9 = scmp.lt.u32.totalorder %s437_s17, %s656_s0 }
  0x19   :  { %p443_p10 = pnand %p441_p9, %p438_p8 }
  0x1b   :  { %446 = shalt.err (!%p443_p10)
}
  0x1c   :  { %s447_s1 = scalar_lea.vmem %s22_s12, 128  ;;  %p452_p12 = scmp.lt.s32.totalorder %s22_s12, %s22_s12 }
  0x1d   :  { %p448_p11 = scmp.ne.s32.totalorder %s22_s12, %s447_s1  ;;  %p453_p13 = scmp.lt.s32.totalorder %s447_s1, %s447_s1 }
  0x1f   :  { %p454_p0 = por %p453_p13, %p452_p12 }
  0x21   :  { %p455_p1 = pnand %p454_p0, %p448_p11 }
  0x23   :  { %458 = shalt.err (!%p455_p1)
}
  0x24   :  { %24 = dma.hbm_to_vmem [thread:$0]  %s656_s0, 128, %s22_s12, [#allocation3]  }
  0x25   :  { %s459_s26 = scalar_lea.hbm %s659_s3, 512 }
  0x26   :  { %p460_p2 = scmp.ne.s32.totalorder %s659_s3, %s459_s26  ;;  %p463_p3 = scmp.lt.u32.totalorder %s459_s26, %s659_s3 }
  0x28   :  { %p465_p4 = pnand %p463_p3, %p460_p2 }
  0x2a   :  { %468 = shalt.err (!%p465_p4)
}
  0x2b   :  { %s469_s9 = scalar_lea.vmem %s45_s14, 512  ;;  %p474_p6 = scmp.lt.s32.totalorder %s45_s14, %s45_s14 }
  0x2c   :  { %p470_p5 = scmp.ne.s32.totalorder %s45_s14, %s469_s9  ;;  %p475_p7 = scmp.lt.s32.totalorder %s469_s9, %s469_s9 }
  0x2e   :  { %p476_p8 = por %p475_p7, %p474_p6 }
  0x30   :  { %p477_p9 = pnand %p476_p8, %p470_p5 }
  0x32   :  { %480 = shalt.err (!%p477_p9)
}
  0x33   :  { %50 = dma.hbm_to_vmem [thread:$0]  %s659_s3, 512, %s45_s14, [#allocation6], %s534_s7, %s534_s7, %s535_s8  }
  0x34   :  { %s538_s11 = smov [#allocation8]   ;;  %s481_s16 = scalar_lea.hbm %s661_s5, 512 }
  0x35   :  { %s58_s12 = sshll.u32 %s538_s11, 4  ;;  %p482_p10 = scmp.ne.s32.totalorder %s661_s5, %s481_s16  ;;  %s59_s12 = int_to_ptr.vmem [resolvable:$true] %s58_s12 }
  0x36   :  { %p485_p11 = scmp.lt.u32.totalorder %s481_s16, %s661_s5 }
  0x38   :  { %p487_p12 = pnand %p485_p11, %p482_p10 }
  0x3a   :  { %490 = shalt.err (!%p487_p12)
}
  0x3b   :  { %s491_s21 = scalar_lea.vmem %s59_s12, 512  ;;  %p496_p0 = scmp.lt.s32.totalorder %s59_s12, %s59_s12 }
  0x3c   :  { %p492_p13 = scmp.ne.s32.totalorder %s59_s12, %s491_s21  ;;  %p497_p1 = scmp.lt.s32.totalorder %s491_s21, %s491_s21 }
  0x3e   :  { %p498_p2 = por %p497_p1, %p496_p0 }
  0x40   :  { %p499_p3 = pnand %p498_p2, %p492_p13 }
  0x42   :  { %502 = shalt.err (!%p499_p3)
}
  0x43   :  { %64 = dma.hbm_to_vmem [thread:$0]  %s661_s5, 512, %s59_s12, [#allocation9], %s534_s7, %s534_s7, %s535_s8  }
  0x44   :  { %525 = dma.done.wait [#allocation3], 128  }
  0x45   :  { %526 = vsyncadd [#allocation3], 4294967168 }
  0x46   :  { %527 = dma.done.wait [#allocation6], 768  }
  0x47   :  { %528 = vsyncadd [#allocation6], 4294966528 }
  0x48   :  { %529 = dma.done.wait [#allocation9], 512  }
  0x49   :  { %530 = vsyncadd [#allocation9], 4294966784  ;;  %v539_v0 = vmov 0.0|0.0   ;;  %vm540_vm0 = vmmov 0   ;;  %v541_v1 = vmov 0.0   ;;  %v78_v2 = vld [vmem:[#allocation5] sm:$0xff] }
  0x4a   :  { %390 = vmatprep.subr.bf16.mxu0 %v539_v0  ;;  %365 = vmatprep.mubr.msk.f32.mxu0 %vm540_vm0, %v541_v1  ;;  %v79_v3 = vld [vmem:[#allocation5 + $0x8] sm:$0xff]  ;;  %v162_v5 = vld [vmem:[#allocation7] sm:$0xff]  ;;  %v163_v6 = vld [vmem:[#allocation7 + $0x8] sm:$0xff]  ;;  %vm87_vm1 = vcmask 130048   ;;  %vm173_vm2 = vcmask 261120  }
  0x4b   :  { %393 = vmatprep.subr.bf16.mxu1 %v539_v0  ;;  %376 = vmatprep.mubr.msk.f32.mxu1 %vm540_vm0, %v541_v1  ;;  %v391_v4 = vpack.c.bf16 %v79_v3, %v78_v2  ;;  %v394_v7 = vpack.c.bf16 %v163_v6, %v162_v5  ;;  %v77_v8 = vld [vmem:[#allocation2] sm:$0xff]  ;;  %v164_v9 = vld [vmem:[#allocation7 + $0x10] sm:$0xff]  ;;  %v165_v10 = vld [vmem:[#allocation7 + $0x18] sm:$0xff] }
  0x4c   :  { %v397_v11 = vpack.c.bf16 %v165_v10, %v164_v9  ;;  %v248_v12 = vld [vmem:[#allocation8] sm:$0xff]  ;;  %v249_v13 = vld [vmem:[#allocation8 + $0x8] sm:$0xff]  ;;  %v250_v20 = vld [vmem:[#allocation8 + $0x10] sm:$0xff] }
  0x4d   :  { %392 = vmatpush3.bf16.msra.mxu0 %v391_v4  ;;  %395 = vmatpush3.bf16.msra.mxu1 %v394_v7  ;;  %v400_v14 = vpack.c.bf16 %v249_v13, %v248_v12  ;;  %v343_v15 = vld [vmem:[%s658_s2] ss:$0 sm:$0xff]  ;;  %v251_v21 = vld [vmem:[#allocation8 + $0x18] sm:$0xff]  ;;  %s542_s2 = smov [#allocation10]  }
  0x4e   :  { %399 = vmatprep.subr.bf16.mxu0 %v539_v0  ;;  %396 = vmatprep.subr.bf16.mxu1 %v539_v0  ;;  %v403_v22 = vpack.c.bf16 %v251_v21, %v250_v20  ;;  %v345_v23 = vld [vmem:[%s660_s4] ss:$0 sm:$0xff]  ;;  %s332_s22 = sshll.u32 %s542_s2, 4  ;;  %s333_s22 = int_to_ptr.vmem [resolvable:$true] %s332_s22 }
  0x4f   :  { %s503_s23 = scalar_lea.vmem %s333_s22, 128  ;;  %p508_p5 = scmp.lt.s32.totalorder %s333_s22, %s333_s22 }
  0x50   :  { %366 = vmatmul.mubr.msk.f32.vlgmr.msra.gmra.mrb[0].mxu0 %vm87_vm1, %v77_v8  ;;  %p504_p4 = scmp.ne.s32.totalorder %s333_s22, %s503_s23  ;;  %p509_p6 = scmp.lt.s32.totalorder %s503_s23, %s503_s23 }
  0x51   :  { %387 = vmatprep.mubr.msk.f32.mxu0 %vm540_vm0, %v541_v1  ;;  %398 = vmatpush3.bf16.msra.mxu1 %v397_v11 }
  0x52   :  { %401 = vmatpush3.bf16.msra.mxu0 %v400_v14  ;;  %p510_p7 = por %p509_p6, %p508_p5 }
  0x53   :  { %402 = vmatprep.subr.bf16.mxu0 %v539_v0 }
  0x54   :  { %p511_p8 = pnand %p510_p7, %p504_p4 }
  0x56   :  { %404 = vmatpush3.bf16.msra.mxu0 %v403_v22 }
 0x123   :  { %v157_v16 = vpop.f32.mrb[0].mxu0 }
 0x124   :  { %v158_v17 = vadd.f32 %v343_v15, %v157_v16  ;;  %v367_v18 = vpop.f32.mrb[1].mxu0 }
 0x126   :  { %v161_v19 = vmax.f32 %v158_v17, 0.0 }
 0x128   :  { %377 = vmatmul.mubr.msk.f32.vlgmr.msra.gmra.mrb[0].mxu1 %vm173_vm2, %v161_v19 }
 0x1fb   :  { %v243_v24 = vpop.f32.mrb[0].mxu1 }
 0x1fc   :  { %v244_v25 = vadd.f32 %v345_v23, %v243_v24  ;;  %v378_v26 = vpop.f32.mrb[1].mxu1 }
 0x1fe   :  { %v247_v27 = vmax.f32 %v244_v25, 0.0 }
 0x200   :  { %388 = vmatmul.mubr.msk.f32.vlgmr.msra.gmra.mrb[2].mxu0 %vm173_vm2, %v247_v27 }
 0x2d3   :  { %v321_v28 = vpop.f32.mrb[2].mxu0 }
 0x2d4   :  { %325 = vst [vmem:[#allocation10] sm:$0xff] %v321_v28  ;;  %v389_v29 = vpop.f32.mrb[3].mxu0 }
 0x2d5   :  { %514 = shalt.err (!%p511_p8)
}
 0x2d6   :  { %s515_s25 = scalar_lea.hbm %s662_s6, 128 }
 0x2d7   :  { %p516_p9 = scmp.ne.s32.totalorder %s662_s6, %s515_s25  ;;  %p519_p10 = scmp.lt.u32.totalorder %s515_s25, %s662_s6 }
 0x2d9   :  { %p521_p11 = pnand %p519_p10, %p516_p9 }
 0x2db   :  { %524 = shalt.err (!%p521_p11)
}
 0x2dc   :  { %335 = dma.vmem_to_hbm [thread:$0]  %s333_s22, 128, %s662_s6, [#allocation4]  }
 0x2dd   :  { %531 = dma.done.wait [#allocation4], 128  }
 0x2de   :  { %532 = vsyncadd [#allocation4], 4294967168 }
 0x2df   :  { %339 = vsyncpa [#allocation3], 1 }
 0x2e0   :  { %340 = vsyncpa [#allocation6], 1 }
 0x2e1   :  { %341 = vsyncpa [#allocation9], 1 }
 0x2e2   :  { %342 = vsyncpa [#allocation4], 1 }

</bundles_post_ra>
